<compile_context>
chip_gen: v5e
topology: v5e:2x2
jax: 0.10.0
libtpu: 0.0.40
codegen_flags: <defaults>
</compile_context>

<pallas_src>
import jax
import jax.numpy as jnp
from jax.experimental import pallas as pl
from jax.experimental.pallas import tpu as pltpu


def _predict_state_kernel(s_ref, init_ref, u_ref, out_ref):
    # s_ref: (1, 3) SMEM  -- [w0, w1, t]
    # init_ref / u_ref / out_ref: (TILE_R, LANES) VMEM tiles
    w0 = s_ref[0, 0]
    w1 = s_ref[0, 1]
    t = s_ref[0, 2]
    # Fold the scalar chain on the scalar path; VPU sees 2 vmul + 1 vadd.
    a = jnp.float32(1.0) + w0 * t * jnp.float32(0.1)
    b = w1 * t * jnp.float32(0.1)
    out_ref[...] = a * init_ref[...] + b * u_ref[...]


def _predict_state_no_u_kernel(s_ref, init_ref, out_ref):
    # Specialized path for params['U'] is None: conv == w0 * initial_state.
    w0 = s_ref[0, 0]
    t = s_ref[0, 2]
    a = jnp.float32(1.0) + w0 * t * jnp.float32(0.1)
    out_ref[...] = a * init_ref[...]


def _choose_layout(total):
    """Pick a lane-dense (rows, LANES) layout and a row tile for `total` elems."""
    lanes = 512 if total >= 8 * 512 else 128
    rows_needed = -(-total // lanes)
    tile_r_max = 1024  # (1024, 512) f32 = 2 MiB per buffer; near HBM roofline
    if rows_needed <= tile_r_max:
        tile_r = max(8, -(-rows_needed // 8) * 8)      # multiple of 8
    else:
        tile_r = tile_r_max
    rows = -(-rows_needed // tile_r) * tile_r          # multiple of tile_r
    return lanes, rows, tile_r


def predict_state(initial_state, params, t_target, conv_weight):
    """Pallas equivalent of SimpleOptimizerModel.forward(x, mode='predict_state').

    initial_state: (N, 1, H, W) float32
    params:        dict, may contain 'U' of shape (N, 1, H, W)
    t_target:      python scalar or 0-d scalar array
    conv_weight:   (1, 2, 1, 1) float32 (Conv2d(2, 1, 1, bias=False).weight)
    """
    initial_state = jnp.asarray(initial_state, jnp.float32)
    N, C, H, W = initial_state.shape
    assert C == 1
    total = N * C * H * W

    u_grid = params.get("U")
    has_u = u_grid is not None

    # Pack all scalars into one SMEM operand: [w0, w1, t].
    w = jnp.asarray(conv_weight, jnp.float32).reshape(2)
    t_val = jnp.asarray(t_target, jnp.float32).reshape(1)
    scalars = jnp.concatenate([w, t_val]).reshape(1, 3)

    # Lane-dense layout + row tiling.
    lanes, rows, tile_r = _choose_layout(total)
    padded = rows * lanes
    grid_r = rows // tile_r

    def to2d(x):
        flat = jnp.asarray(x, jnp.float32).reshape(-1)
        if padded != total:
            flat = jnp.pad(flat, (0, padded - total))
        return flat.reshape(rows, lanes)

    init2d = to2d(initial_state)

    tile_spec = pl.BlockSpec((tile_r, lanes), lambda i: (i, 0))
    compiler_params = pltpu.CompilerParams(
        dimension_semantics=("parallel",),
        vmem_limit_bytes=24 << 20,
    )
    out_shape = jax.ShapeDtypeStruct((rows, lanes), jnp.float32)

    if has_u:
        u2d = to2d(u_grid)
        out2d = pl.pallas_call(
            _predict_state_kernel,
            out_shape=out_shape,
            grid_spec=pltpu.PrefetchScalarGridSpec(
                num_scalar_prefetch=0,
                grid=(grid_r,),
                in_specs=[
                    pl.BlockSpec(memory_space=pltpu.SMEM),  # packed scalars
                    tile_spec,                              # initial_state
                    tile_spec,                              # U_grid
                ],
                out_specs=tile_spec,
            ),
            compiler_params=compiler_params,
        )(scalars, init2d, u2d)
    else:
        # U is None: conv term is w0 * initial_state; do not stream zeros.
        out2d = pl.pallas_call(
            _predict_state_no_u_kernel,
            out_shape=out_shape,
            grid_spec=pltpu.PrefetchScalarGridSpec(
                num_scalar_prefetch=0,
                grid=(grid_r,),
                in_specs=[
                    pl.BlockSpec(memory_space=pltpu.SMEM),  # packed scalars
                    tile_spec,                              # initial_state
                ],
                out_specs=tile_spec,
            ),
            compiler_params=compiler_params,
        )(scalars, init2d)

    return out2d.reshape(-1)[:total].reshape(N, 1, H, W)


if __name__ == "__main__":
    key = jax.random.PRNGKey(0)
    k1, k2, k3, k4 = jax.random.split(key, 4)

    # Deterministic parameter init, mirroring torch.nn.init.constant_(weight, 1.0)
    conv_weight = jnp.ones((1, 2, 1, 1), dtype=jnp.float32)
    t_target = 2.5

    # --- Small shape consistent with the module (N=2, C=1, H=W=16) ---
    N, H, W = 2, 16, 16
    initial_state = jax.random.normal(k1, (N, 1, H, W), dtype=jnp.float32)
    u_grid = jax.random.normal(k2, (N, 1, H, W), dtype=jnp.float32)

    pred = jax.block_until_ready(
        predict_state(initial_state, {"U": u_grid}, t_target, conv_weight)
    )
    ref = initial_state + (initial_state + u_grid) * jnp.float32(t_target) * 0.1
    assert pred.shape == (N, 1, H, W)
    assert jnp.allclose(pred, ref, atol=1e-5, rtol=1e-5)

    # --- params['U'] is None path (specialized single-input kernel) ---
    pred_no_u = jax.block_until_ready(
        predict_state(initial_state, {}, t_target, conv_weight)
    )
    ref_no_u = initial_state + initial_state * jnp.float32(t_target) * 0.1
    assert jnp.allclose(pred_no_u, ref_no_u, atol=1e-5, rtol=1e-5)

    # --- Larger shape to exercise the multi-tile lane-dense grid path ---
    N2, H2, W2 = 2, 512, 512
    init_big = jax.random.normal(k3, (N2, 1, H2, W2), dtype=jnp.float32)
    u_big = jax.random.normal(k4, (N2, 1, H2, W2), dtype=jnp.float32)
    pred_big = jax.block_until_ready(
        predict_state(init_big, {"U": u_big}, t_target, conv_weight)
    )
    ref_big = init_big + (init_big + u_big) * jnp.float32(t_target) * 0.1
    assert jnp.allclose(pred_big, ref_big, atol=1e-5, rtol=1e-5)

    print("KERNEL_OK")
</pallas_src>

<mosaic_0001>
module attributes {stable_mosaic.version = 11 : i64} {
  func.func @_predict_state_kernel(%arg0: i32, %arg1: memref<1x3xf32, #tpu.memory_space<smem>>, %arg2: memref<8x128xf32, #tpu.memory_space<vmem>>, %arg3: memref<8x128xf32, #tpu.memory_space<vmem>>, %arg4: memref<8x128xf32, #tpu.memory_space<vmem>>) attributes {dimension_semantics = [#tpu.dimension_semantics<parallel>], iteration_bounds = array<i64: 1>, scalar_prefetch = 0 : i64, scratch_operands = 0 : i64, tpu.core_type = #tpu.core_type<tc>, window_params = [{transform_indices = @transform_0, window_bounds = array<i64: 1, 3>}, {transform_indices = @transform_1, window_bounds = array<i64: 8, 128>}, {transform_indices = @transform_2, window_bounds = array<i64: 8, 128>}, {transform_indices = @transform_3, window_bounds = array<i64: 8, 128>}]} {
    %c0 = arith.constant 0 : index
    %c0_0 = arith.constant 0 : index
    %0 = memref.load %arg1[%c0, %c0_0] : memref<1x3xf32, #tpu.memory_space<smem>>
    %c0_1 = arith.constant 0 : index
    %c1 = arith.constant 1 : index
    %1 = memref.load %arg1[%c0_1, %c1] : memref<1x3xf32, #tpu.memory_space<smem>>
    %c0_2 = arith.constant 0 : index
    %c2 = arith.constant 2 : index
    %2 = memref.load %arg1[%c0_2, %c2] : memref<1x3xf32, #tpu.memory_space<smem>>
    %3 = arith.mulf %0, %2 : f32
    %cst = arith.constant 1.000000e-01 : f32
    %4 = arith.mulf %3, %cst : f32
    %cst_3 = arith.constant 1.000000e+00 : f32
    %5 = arith.addf %cst_3, %4 : f32
    %6 = arith.mulf %1, %2 : f32
    %cst_4 = arith.constant 1.000000e-01 : f32
    %7 = arith.mulf %6, %cst_4 : f32
    %c0_5 = arith.constant 0 : index
    %c0_6 = arith.constant 0 : index
    %8 = vector.load %arg2[%c0_5, %c0_6] : memref<8x128xf32, #tpu.memory_space<vmem>>, vector<8x128xf32>
    %9 = vector.broadcast %5 : f32 to vector<8x128xf32>
    %10 = arith.mulf %9, %8 : vector<8x128xf32>
    %c0_7 = arith.constant 0 : index
    %c0_8 = arith.constant 0 : index
    %11 = vector.load %arg3[%c0_7, %c0_8] : memref<8x128xf32, #tpu.memory_space<vmem>>, vector<8x128xf32>
    %12 = vector.broadcast %7 : f32 to vector<8x128xf32>
    %13 = arith.mulf %12, %11 : vector<8x128xf32>
    %14 = arith.addf %10, %13 : vector<8x128xf32>
    %c0_9 = arith.constant 0 : index
    %c0_10 = arith.constant 0 : index
    %15 = vector.load %arg4[%c0_9, %c0_10] : memref<8x128xf32, #tpu.memory_space<vmem>>, vector<8x128xf32>
    tpu.vector_store %arg4[%c0_9, %c0_10], %14 {strides = array<i32>} : memref<8x128xf32, #tpu.memory_space<vmem>>, vector<8x128xf32>,
    return
  }
  func.func @transform_0(%arg0: i32) -> (i32, i32) {
    %c0_i32 = arith.constant 0 : i32
    %c0_i32_0 = arith.constant 0 : i32
    %c0_i32_1 = arith.constant 0 : i32
    return %c0_i32, %c0_i32_0 : i32, i32
  }
  func.func @transform_1(%arg0: i32) -> (i32, i32) {
    %c0_i32 = arith.constant 0 : i32
    %c0_i32_0 = arith.constant 0 : i32
    return %arg0, %c0_i32 : i32, i32
  }
  func.func @transform_2(%arg0: i32) -> (i32, i32) {
    %c0_i32 = arith.constant 0 : i32
    %c0_i32_0 = arith.constant 0 : i32
    return %arg0, %c0_i32 : i32, i32
  }
  func.func @transform_3(%arg0: i32) -> (i32, i32) {
    %c0_i32 = arith.constant 0 : i32
    %c0_i32_0 = arith.constant 0 : i32
    return %arg0, %c0_i32 : i32, i32
  }
}

</mosaic_0001>

<bundles_post_ra>
// kernel: tpu_custom_call.1
= control target key start
LH: loop header
LB: loop body
LE: loop exit
PB: predicated region body
PF: predicated region fallthrough
CT: control target
= control target key end

     0   :  { %8 = vsyncpa [#allocation5], 0  ;;  %s225_s0 = inlined_call_operand.hbm [shape: f32[1,3], index: 0, kind: input, shape index: {}]   ;;  %s226_s1 = inlined_call_operand.hbm [shape: f32[8,128], index: 1, kind: input, shape index: {}]   ;;  %s227_s2 = inlined_call_operand.hbm [shape: f32[8,128], index: 2, kind: input, shape index: {}]   ;;  %s228_s3 = inlined_call_operand.hbm [shape: f32[8,128], index: 3, kind: output, shape index: {}]  }
   0x1   :  { %9 = vsyncpa [#allocation3], 0 }
   0x2   :  { %10 = vsyncpa [#allocation8], 0 }
   0x3   :  { %11 = vsyncpa [#allocation4], 0  ;;  %s17_s14 = sshll.u32 %s225_s0, 4  ;;  %s26_s17 = sshll.u32 %s226_s1, 4  ;;  %s18_s14 = int_to_ptr.hbm [resolvable:$true] %s17_s14  ;;  %s27_s17 = int_to_ptr.hbm [resolvable:$true] %s26_s17 }
   0x4   :  { %s189_s18 = smov [#allocation2]   ;;  %s190_s19 = smov [#allocation6]  }
   0x5   :  { %20 = dma.hbm_to_smem %s18_s14, 16, %s189_s18, [#allocation5]  }
   0x6   :  { %s28_s20 = sshll.u32 %s190_s19, 4  ;;  %s37_s23 = sshll.u32 %s227_s2, 4  ;;  %s29_s20 = int_to_ptr.vmem [resolvable:$true] %s28_s20  ;;  %s38_s23 = int_to_ptr.hbm [resolvable:$true] %s37_s23 }
   0x7   :  { %31 = dma.hbm_to_vmem [thread:$0]  %s27_s17, 128, %s29_s20, [#allocation3]  }
   0x8   :  { %s191_s24 = smov [#allocation7]  }
   0x9   :  { %s39_s25 = sshll.u32 %s191_s24, 4  ;;  %s40_s25 = int_to_ptr.vmem [resolvable:$true] %s39_s25 }
   0xa   :  { %42 = dma.hbm_to_vmem [thread:$0]  %s38_s23, 128, %s40_s25, [#allocation8]  }
   0xb   :  { %181 = dma.done.wait [#allocation5], 16  }
   0xc   :  { %182 = vsyncadd [#allocation5], 4294967280 }
   0xd   :  { %183 = dma.done.wait [#allocation3], 128  }
   0xe   :  { %184 = vsyncadd [#allocation3], 4294967168 }
   0xf   :  { %185 = dma.done.wait [#allocation8], 128  }
  0x10   :  { %186 = vsyncadd [#allocation8], 4294967168 }
  0x11   :  { %55 = sfence }
  0x12   :  { %s56_s0 = sld [smem:[#allocation2]]  ;;  %v67_v0 = vld [vmem:[#allocation7] sm:$0xff]  ;;  %v64_v1 = vld [vmem:[#allocation6] sm:$0xff]  ;;  %s192_s4 = smov [#allocation9]  }
  0x13   :  { %s91_s1 = sld [smem:[#allocation2 + $0x1]]  ;;  %s77_s5 = sshll.u32 %s192_s4, 4  ;;  %s78_s5 = int_to_ptr.vmem [resolvable:$true] %s77_s5 }
  0x14   :  { %s92_s26 = sld [smem:[#allocation2 + $0x2]]  ;;  %s79_s8 = sshll.u32 %s228_s3, 4  ;;  %s80_s8 = int_to_ptr.hbm [resolvable:$true] %s79_s8 }
  0x1a   :  { %s59_s27 = smul.f32 %s92_s26, %s56_s0 }
  0x1b   :  { %s62_s28 = smul.f32 %s92_s26, %s91_s1 }
  0x1c   :  { %s60_s2 = smul.f32 0.1, %s59_s27 }
  0x1d   :  { %s63_s29 = smul.f32 0.1, %s62_s28 }
  0x1e   :  { %s61_s30 = sadd.f32 1.0, %s60_s2 }
  0x1f   :  { %v68_v2 = vstv %s63_s29 }
  0x20   :  { %v65_v3 = vstv %s61_s30  ;;  %v69_v4 = vmul.f32 %v68_v2, %v67_v0 }
  0x21   :  { %v66_v5 = vmul.f32 %v65_v3, %v64_v1 }
  0x23   :  { %v70_v6 = vadd.f32 %v69_v4, %v66_v5 }
  0x25   :  { %71 = vst [vmem:[#allocation9] sm:$0xff] %v70_v6 }
  0x26   :  { %82 = dma.vmem_to_hbm [thread:$0]  %s78_s5, 128, %s80_s8, [#allocation4]  }
  0x27   :  { %187 = dma.done.wait [#allocation4], 128  }
  0x28   :  { %188 = vsyncadd [#allocation4], 4294967168 }
  0x29   :  { %87 = vsyncpa [#allocation3], 1 }
  0x2a   :  { %88 = vsyncpa [#allocation8], 1 }
  0x2b   :  { %89 = vsyncpa [#allocation4], 1 }
  0x2c   :  { %90 = vsyncpa [#allocation5], 1 }

</bundles_post_ra>
